<compile_context>
chip_gen: v5e
topology: v5e:2x2
jax: 0.10.0
libtpu: 0.0.40
codegen_flags: <defaults>
</compile_context>

<pallas_src>
import functools

import jax
import jax.numpy as jnp
from jax import lax
from jax.experimental import pallas as pl
from jax.experimental.pallas import tpu as pltpu


def _conv_gn_mish_kernel(x_ref, w_ref, b_ref, gamma_ref, beta_ref, gsel_ref,
                         o_ref, *, kernel_size, length, eps):
    # x_ref:     (1, Cin, L + 2*pad)  bf16 (or f32)
    # w_ref:     (K, Cout, Cin)       bf16 (or f32)
    # b/gamma/beta_ref: (Cout, 1)     f32
    # gsel_ref:  (Cout, Cout)         f32, group-mate selector / (L*group_size)
    # o_ref:     (1, Cout, L)         f32
    L = length

    # --- Conv1d as K shifted matmuls on the MXU (f32 accumulation) ---
    y = jnp.dot(w_ref[0], x_ref[0, :, 0:L],
                preferred_element_type=jnp.float32)            # (Cout, L)
    for k in range(1, kernel_size):
        y = y + jnp.dot(w_ref[k], x_ref[0, :, k:k + L],
                        preferred_element_type=jnp.float32)
    y = y + b_ref[...]                                          # (Cout, L)

    # --- GroupNorm (two-pass, f32) ---
    gsel = gsel_ref[...]                                        # (C, C)
    s_c = jnp.sum(y, axis=1, keepdims=True)                     # (C, 1) lane reduce
    mean_c = jnp.dot(gsel, s_c,
                     preferred_element_type=jnp.float32)        # per-channel group mean
    d = y - mean_c
    sq_c = jnp.sum(d * d, axis=1, keepdims=True)                # (C, 1)
    var_c = jnp.dot(gsel, sq_c,
                    preferred_element_type=jnp.float32)         # per-channel group var
    inv_c = lax.rsqrt(var_c + eps)
    yn = d * (inv_c * gamma_ref[...]) + beta_ref[...]           # (Cout, L)

    # --- Mish: x * tanh(softplus(x)) == x * ((1+e)^2 - 1) / ((1+e)^2 + 1) ---
    # Single exp; (1+e)^2 - 1 written as e*(2+e) to avoid cancellation.
    e = jnp.exp(yn)
    num = e * (2.0 + e)                                         # (1+e)^2 - 1
    den = num + 2.0                                             # (1+e)^2 + 1
    r = pl.reciprocal(den, approx=True)                         # EUP approx recip
    r = r * (2.0 - den * r)                                     # one Newton step -> f32 accurate
    mish = yn * num * r
    # Guard: for large yn, e^2 overflows (inf/nan in the dead branch); true limit is yn.
    o_ref[0] = jnp.where(yn > 20.0, yn, mish)


def conv1d_block(x, w, b, gamma, beta, *, n_groups=8, eps=1e-5,
                 compute_dtype=jnp.bfloat16):
    """x: (B, Cin, L); w: (Cout, Cin, K); b/gamma/beta: (Cout,).

    Returns (B, Cout, L) float32 — same semantics as the PyTorch Conv1dBlock.
    """
    B, Cin, L = x.shape
    Cout, _, K = w.shape
    assert K % 2 == 1, "odd kernel_size assumed (same-length output)"
    assert Cout % n_groups == 0
    pad = K // 2
    Lp = L + 2 * pad
    gs = Cout // n_groups

    # Only glue left in the wrapper: halo-pad + cast (no im2col, no transposes).
    x_pad = jnp.pad(x, ((0, 0), (0, 0), (pad, pad))).astype(compute_dtype)  # (B,Cin,Lp)
    w_k = jnp.transpose(w, (2, 0, 1)).astype(compute_dtype)                 # (K,Cout,Cin)
    b2 = b.reshape(Cout, 1).astype(jnp.float32)
    g2 = gamma.reshape(Cout, 1).astype(jnp.float32)
    be2 = beta.reshape(Cout, 1).astype(jnp.float32)

    # Group-mate selector: gsel[c, c'] = 1/(L*gs) if c, c' in the same group.
    cids = jnp.arange(Cout)
    gsel = ((cids[:, None] // gs) == (cids[None, :] // gs)).astype(jnp.float32)
    gsel = gsel / float(L * gs)                                             # (Cout,Cout)

    kernel = functools.partial(_conv_gn_mish_kernel,
                               kernel_size=K, length=L, eps=eps)

    itemsize = jnp.dtype(compute_dtype).itemsize
    cost = pl.CostEstimate(
        flops=2 * B * L * Cout * Cin * K + 12 * B * L * Cout,
        transcendentals=B * L * Cout,
        bytes_accessed=(B * Cin * Lp + K * Cout * Cin) * itemsize
                       + B * Cout * L * 4 + (3 * Cout + Cout * Cout) * 4,
    )

    out = pl.pallas_call(
        kernel,
        out_shape=jax.ShapeDtypeStruct((B, Cout, L), jnp.float32),
        grid=(B,),
        in_specs=[
            pl.BlockSpec((1, Cin, Lp), lambda bi: (bi, 0, 0)),
            pl.BlockSpec((K, Cout, Cin), lambda bi: (0, 0, 0)),
            pl.BlockSpec((Cout, 1), lambda bi: (0, 0)),
            pl.BlockSpec((Cout, 1), lambda bi: (0, 0)),
            pl.BlockSpec((Cout, 1), lambda bi: (0, 0)),
            pl.BlockSpec((Cout, Cout), lambda bi: (0, 0)),
        ],
        out_specs=pl.BlockSpec((1, Cout, L), lambda bi: (bi, 0, 0)),
        compiler_params=pltpu.CompilerParams(
            dimension_semantics=("parallel",),
            vmem_limit_bytes=48 * 1024 * 1024),
        cost_estimate=cost,
    )(x_pad, w_k, b2, g2, be2, gsel)

    return out  # already (B, Cout, L) — no transpose needed


def _reference(x, w, b, gamma, beta, *, n_groups=8, eps=1e-5):
    """Pure-JAX f32 reference matching the PyTorch module."""
    K = w.shape[-1]
    pad = K // 2
    y = lax.conv_general_dilated(
        x, w, window_strides=(1,), padding=[(pad, pad)],
        dimension_numbers=("NCH", "OIH", "NCH"))
    y = y + b[None, :, None]
    B, C, L = y.shape
    gs = C // n_groups
    yg = y.reshape(B, n_groups, gs, L)
    mean = yg.mean(axis=(2, 3), keepdims=True)
    var = yg.var(axis=(2, 3), keepdims=True)
    yn = ((yg - mean) / jnp.sqrt(var + eps)).reshape(B, C, L)
    yn = yn * gamma[None, :, None] + beta[None, :, None]
    return yn * jnp.tanh(jnp.log1p(jnp.exp(yn)))


if __name__ == "__main__":
    # Shapes consistent with Conv1dBlock(inp_channels=4, out_channels=16,
    # kernel_size=3, n_groups=8) applied to x of shape (batch, channels, horizon).
    B, Cin, L = 2, 4, 16
    Cout, K, n_groups = 16, 3, 8

    key = jax.random.PRNGKey(0)
    kx, kw, kb, kg, kbe = jax.random.split(key, 5)
    x = jax.random.normal(kx, (B, Cin, L), dtype=jnp.float32)
    w = jax.random.normal(kw, (Cout, Cin, K), dtype=jnp.float32) * 0.1
    b = jax.random.normal(kb, (Cout,), dtype=jnp.float32) * 0.1
    gamma = jnp.ones((Cout,), jnp.float32) + 0.1 * jax.random.normal(kg, (Cout,))
    beta = 0.1 * jax.random.normal(kbe, (Cout,), dtype=jnp.float32)

    out = conv1d_block(x, w, b, gamma, beta, n_groups=n_groups)
    out = jax.block_until_ready(out)
    assert out.shape == (B, Cout, L)

    # Reference sees the same bf16-rounded conv operands (the kernel's MXU uses
    # bf16 inputs with f32 accumulation), so this checks the kernel math
    # (conv structure, GroupNorm, Mish) at tight tolerance.
    xq = x.astype(jnp.bfloat16).astype(jnp.float32)
    wq = w.astype(jnp.bfloat16).astype(jnp.float32)
    ref = _reference(xq, wq, b, gamma, beta, n_groups=n_groups)
    err = float(jnp.max(jnp.abs(out - ref)))
    assert err < 2e-3, f"mismatch vs reference: {err}"

    print("KERNEL_OK")
</pallas_src>

<mosaic_0001>
module attributes {stable_mosaic.version = 11 : i64} {
  func.func @_conv_gn_mish_kernel(%arg0: i32, %arg1: memref<1x4x18xbf16, #tpu.memory_space<vmem>>, %arg2: memref<3x16x4xbf16, #tpu.memory_space<vmem>>, %arg3: memref<16x1xf32, #tpu.memory_space<vmem>>, %arg4: memref<16x1xf32, #tpu.memory_space<vmem>>, %arg5: memref<16x1xf32, #tpu.memory_space<vmem>>, %arg6: memref<16x16xf32, #tpu.memory_space<vmem>>, %arg7: memref<1x16x16xf32, #tpu.memory_space<vmem>>) attributes {dimension_semantics = [#tpu.dimension_semantics<parallel>], iteration_bounds = array<i64: 2>, scalar_prefetch = 0 : i64, scratch_operands = 0 : i64, tpu.core_type = #tpu.core_type<tc>, window_params = [{transform_indices = @transform_0, window_bounds = array<i64: 1, 4, 18>}, {pipeline_mode = #tpu.pipeline_mode<synchronous>, transform_indices = @transform_1, window_bounds = array<i64: 3, 16, 4>}, {pipeline_mode = #tpu.pipeline_mode<synchronous>, transform_indices = @transform_2, window_bounds = array<i64: 16, 1>}, {pipeline_mode = #tpu.pipeline_mode<synchronous>, transform_indices = @transform_3, window_bounds = array<i64: 16, 1>}, {pipeline_mode = #tpu.pipeline_mode<synchronous>, transform_indices = @transform_4, window_bounds = array<i64: 16, 1>}, {pipeline_mode = #tpu.pipeline_mode<synchronous>, transform_indices = @transform_5, window_bounds = array<i64: 16, 16>}, {transform_indices = @transform_6, window_bounds = array<i64: 1, 16, 16>}]} {
    %c0 = arith.constant 0 : index
    %c0_0 = arith.constant 0 : index
    %c0_1 = arith.constant 0 : index
    %0 = vector.load %arg2[%c0, %c0_0, %c0_1] : memref<3x16x4xbf16, #tpu.memory_space<vmem>>, vector<1x16x4xbf16>
    %1 = vector.shape_cast %0 : vector<1x16x4xbf16> to vector<16x4xbf16>
    %c0_2 = arith.constant 0 : index
    %c0_3 = arith.constant 0 : index
    %c0_4 = arith.constant 0 : index
    %2 = vector.load %arg1[%c0_2, %c0_3, %c0_4] : memref<1x4x18xbf16, #tpu.memory_space<vmem>>, vector<1x4x16xbf16>
    %3 = vector.shape_cast %2 : vector<1x4x16xbf16> to vector<4x16xbf16>
    %cst = arith.constant dense<0.000000e+00> : vector<16x16xf32>
    %4 = tpu.matmul %1, %3, %cst {dimension_numbers = #tpu.dot_dimension_numbers<[1], [0], [0], [1], [0, 0, 1, 1], [], []>} : vector<16x4xbf16>, vector<4x16xbf16>, vector<16x16xf32> -> vector<16x16xf32>
    %c1 = arith.constant 1 : index
    %c0_5 = arith.constant 0 : index
    %c0_6 = arith.constant 0 : index
    %5 = vector.load %arg2[%c1, %c0_5, %c0_6] : memref<3x16x4xbf16, #tpu.memory_space<vmem>>, vector<1x16x4xbf16>
    %6 = vector.shape_cast %5 : vector<1x16x4xbf16> to vector<16x4xbf16>
    %c0_7 = arith.constant 0 : index
    %c0_8 = arith.constant 0 : index
    %c1_9 = arith.constant 1 : index
    %7 = vector.load %arg1[%c0_7, %c0_8, %c1_9] : memref<1x4x18xbf16, #tpu.memory_space<vmem>>, vector<1x4x16xbf16>
    %8 = vector.shape_cast %7 : vector<1x4x16xbf16> to vector<4x16xbf16>
    %cst_10 = arith.constant dense<0.000000e+00> : vector<16x16xf32>
    %9 = tpu.matmul %6, %8, %cst_10 {dimension_numbers = #tpu.dot_dimension_numbers<[1], [0], [0], [1], [0, 0, 1, 1], [], []>} : vector<16x4xbf16>, vector<4x16xbf16>, vector<16x16xf32> -> vector<16x16xf32>
    %10 = arith.addf %4, %9 : vector<16x16xf32>
    %c2 = arith.constant 2 : index
    %c0_11 = arith.constant 0 : index
    %c0_12 = arith.constant 0 : index
    %11 = vector.load %arg2[%c2, %c0_11, %c0_12] : memref<3x16x4xbf16, #tpu.memory_space<vmem>>, vector<1x16x4xbf16>
    %12 = vector.shape_cast %11 : vector<1x16x4xbf16> to vector<16x4xbf16>
    %c0_13 = arith.constant 0 : index
    %c0_14 = arith.constant 0 : index
    %c2_15 = arith.constant 2 : index
    %13 = vector.load %arg1[%c0_13, %c0_14, %c2_15] : memref<1x4x18xbf16, #tpu.memory_space<vmem>>, vector<1x4x16xbf16>
    %14 = vector.shape_cast %13 : vector<1x4x16xbf16> to vector<4x16xbf16>
    %cst_16 = arith.constant dense<0.000000e+00> : vector<16x16xf32>
    %15 = tpu.matmul %12, %14, %cst_16 {dimension_numbers = #tpu.dot_dimension_numbers<[1], [0], [0], [1], [0, 0, 1, 1], [], []>} : vector<16x4xbf16>, vector<4x16xbf16>, vector<16x16xf32> -> vector<16x16xf32>
    %16 = arith.addf %10, %15 : vector<16x16xf32>
    %c0_17 = arith.constant 0 : index
    %c0_18 = arith.constant 0 : index
    %17 = vector.load %arg3[%c0_17, %c0_18] : memref<16x1xf32, #tpu.memory_space<vmem>>, vector<16x1xf32>
    %18 = vector.broadcast %17 : vector<16x1xf32> to vector<16x16xf32>
    %19 = arith.addf %16, %18 : vector<16x16xf32>
    %c0_19 = arith.constant 0 : index
    %c0_20 = arith.constant 0 : index
    %20 = vector.load %arg6[%c0_19, %c0_20] : memref<16x16xf32, #tpu.memory_space<vmem>>, vector<16x16xf32>
    %cst_21 = arith.constant dense<0.000000e+00> : vector<16xf32>
    %21 = vector.multi_reduction <add>, %19, %cst_21 [1] : vector<16x16xf32> to vector<16xf32>
    %22 = vector.shape_cast %21 : vector<16xf32> to vector<16x1xf32>
    %cst_22 = arith.constant dense<0.000000e+00> : vector<16x1xf32>
    %23 = tpu.matmul %20, %22, %cst_22 {dimension_numbers = #tpu.dot_dimension_numbers<[1], [0], [0], [1], [0, 0, 1, 1], [], []>} : vector<16x16xf32>, vector<16x1xf32>, vector<16x1xf32> -> vector<16x1xf32>
    %24 = vector.broadcast %23 : vector<16x1xf32> to vector<16x16xf32>
    %25 = arith.subf %19, %24 : vector<16x16xf32>
    %26 = arith.mulf %25, %25 : vector<16x16xf32>
    %cst_23 = arith.constant dense<0.000000e+00> : vector<16xf32>
    %27 = vector.multi_reduction <add>, %26, %cst_23 [1] : vector<16x16xf32> to vector<16xf32>
    %28 = vector.shape_cast %27 : vector<16xf32> to vector<16x1xf32>
    %cst_24 = arith.constant dense<0.000000e+00> : vector<16x1xf32>
    %29 = tpu.matmul %20, %28, %cst_24 {dimension_numbers = #tpu.dot_dimension_numbers<[1], [0], [0], [1], [0, 0, 1, 1], [], []>} : vector<16x16xf32>, vector<16x1xf32>, vector<16x1xf32> -> vector<16x1xf32>
    %cst_25 = arith.constant 9.99999974E-6 : f32
    %30 = vector.broadcast %cst_25 : f32 to vector<16x1xf32>
    %31 = arith.addf %29, %30 : vector<16x1xf32>
    %32 = math.rsqrt %31 : vector<16x1xf32>
    %c0_26 = arith.constant 0 : index
    %c0_27 = arith.constant 0 : index
    %33 = vector.load %arg4[%c0_26, %c0_27] : memref<16x1xf32, #tpu.memory_space<vmem>>, vector<16x1xf32>
    %34 = arith.mulf %32, %33 : vector<16x1xf32>
    %35 = vector.broadcast %34 : vector<16x1xf32> to vector<16x16xf32>
    %36 = arith.mulf %25, %35 : vector<16x16xf32>
    %c0_28 = arith.constant 0 : index
    %c0_29 = arith.constant 0 : index
    %37 = vector.load %arg5[%c0_28, %c0_29] : memref<16x1xf32, #tpu.memory_space<vmem>>, vector<16x1xf32>
    %38 = vector.broadcast %37 : vector<16x1xf32> to vector<16x16xf32>
    %39 = arith.addf %36, %38 : vector<16x16xf32>
    %40 = math.exp %39 : vector<16x16xf32>
    %cst_30 = arith.constant 2.000000e+00 : f32
    %41 = vector.broadcast %cst_30 : f32 to vector<16x16xf32>
    %42 = arith.addf %41, %40 : vector<16x16xf32>
    %43 = arith.mulf %40, %42 : vector<16x16xf32>
    %cst_31 = arith.constant 2.000000e+00 : f32
    %44 = vector.broadcast %cst_31 : f32 to vector<16x16xf32>
    %45 = arith.addf %43, %44 : vector<16x16xf32>
    %46 = tpu.reciprocal %45 {approx = true} : vector<16x16xf32> -> vector<16x16xf32>
    %47 = arith.mulf %45, %46 : vector<16x16xf32>
    %cst_32 = arith.constant 2.000000e+00 : f32
    %48 = vector.broadcast %cst_32 : f32 to vector<16x16xf32>
    %49 = arith.subf %48, %47 : vector<16x16xf32>
    %50 = arith.mulf %46, %49 : vector<16x16xf32>
    %51 = arith.mulf %39, %43 : vector<16x16xf32>
    %52 = arith.mulf %51, %50 : vector<16x16xf32>
    %cst_33 = arith.constant 2.000000e+01 : f32
    %53 = vector.broadcast %cst_33 : f32 to vector<16x16xf32>
    %54 = arith.cmpf ogt, %39, %53 : vector<16x16xf32>
    %55 = arith.select %54, %39, %52 : vector<16x16xi1>, vector<16x16xf32>
    %c0_34 = arith.constant 0 : index
    %c0_35 = arith.constant 0 : index
    %c0_36 = arith.constant 0 : index
    %56 = vector.load %arg7[%c0_34, %c0_35, %c0_36] : memref<1x16x16xf32, #tpu.memory_space<vmem>>, vector<1x16x16xf32>
    %57 = vector.shape_cast %56 : vector<1x16x16xf32> to vector<16x16xf32>
    %58 = vector.shape_cast %55 : vector<16x16xf32> to vector<1x16x16xf32>
    tpu.vector_store %arg7[%c0_34, %c0_35, %c0_36], %58 {strides = array<i32>} : memref<1x16x16xf32, #tpu.memory_space<vmem>>, vector<1x16x16xf32>,
    return
  }
  func.func @transform_0(%arg0: i32) -> (i32, i32, i32) {
    %c0_i32 = arith.constant 0 : i32
    %c0_i32_0 = arith.constant 0 : i32
    %c0_i32_1 = arith.constant 0 : i32
    return %arg0, %c0_i32, %c0_i32_0 : i32, i32, i32
  }
  func.func @transform_1(%arg0: i32) -> (i32, i32, i32) {
    %c0_i32 = arith.constant 0 : i32
    %c0_i32_0 = arith.constant 0 : i32
    %c0_i32_1 = arith.constant 0 : i32
    %c0_i32_2 = arith.constant 0 : i32
    return %c0_i32, %c0_i32_0, %c0_i32_1 : i32, i32, i32
  }
  func.func @transform_2(%arg0: i32) -> (i32, i32) {
    %c0_i32 = arith.constant 0 : i32
    %c0_i32_0 = arith.constant 0 : i32
    %c0_i32_1 = arith.constant 0 : i32
    return %c0_i32, %c0_i32_0 : i32, i32
  }
  func.func @transform_3(%arg0: i32) -> (i32, i32) {
    %c0_i32 = arith.constant 0 : i32
    %c0_i32_0 = arith.constant 0 : i32
    %c0_i32_1 = arith.constant 0 : i32
    return %c0_i32, %c0_i32_0 : i32, i32
  }
  func.func @transform_4(%arg0: i32) -> (i32, i32) {
    %c0_i32 = arith.constant 0 : i32
    %c0_i32_0 = arith.constant 0 : i32
    %c0_i32_1 = arith.constant 0 : i32
    return %c0_i32, %c0_i32_0 : i32, i32
  }
  func.func @transform_5(%arg0: i32) -> (i32, i32) {
    %c0_i32 = arith.constant 0 : i32
    %c0_i32_0 = arith.constant 0 : i32
    %c0_i32_1 = arith.constant 0 : i32
    return %c0_i32, %c0_i32_0 : i32, i32
  }
  func.func @transform_6(%arg0: i32) -> (i32, i32, i32) {
    %c0_i32 = arith.constant 0 : i32
    %c0_i32_0 = arith.constant 0 : i32
    %c0_i32_1 = arith.constant 0 : i32
    return %arg0, %c0_i32, %c0_i32_0 : i32, i32, i32
  }
}

</mosaic_0001>

<bundles_post_ra>
// kernel: tpu_custom_call.1
= control target key start
LH: loop header
LB: loop body
LE: loop exit
PB: predicated region body
PF: predicated region fallthrough
CT: control target
= control target key end

     0   :  { %11 = vsyncpa [#allocation3], 0  ;;  %s945_s0 = inlined_call_operand.vmem [shape: bf16[2,4,18], index: 0, kind: input, shape index: {}]   ;;  %s946_s1 = inlined_call_operand.vmem [shape: bf16[3,16,4], index: 1, kind: input, shape index: {}]   ;;  %s947_s2 = inlined_call_operand.vmem [shape: f32[16,1], index: 2, kind: input, shape index: {}]   ;;  %s948_s3 = inlined_call_operand.vmem [shape: f32[16,1], index: 3, kind: input, shape index: {}]   ;;  %s949_s4 = inlined_call_operand.vmem [shape: f32[16,1], index: 4, kind: input, shape index: {}]   ;;  %s950_s5 = inlined_call_operand.vmem [shape: f32[16,16], index: 5, kind: input, shape index: {}]   ;;  %s951_s6 = inlined_call_operand.hbm [shape: f32[2,16,16], index: 6, kind: output, shape index: {}]  }
   0x1   :  { %13 = vsyncpa [#allocation3 + $0x1], 0  ;;  %s802_s21 = smov 0   ;;  %s804_s22 = smov 0  }
   0x2   :  { %s806_s23 = smov 0   ;;  %s808_s24 = smov 0  }
   0x3 LB: > { %s823_s25 = sadd.s32 4294967295, %s760_s24   ;;  %s599_s26 = sadd.s32 4294967294, %s760_s24   ;;  %s760_s24 = sphi %s808_s24, %s957_s24   ;;  %s756_s23 = sphi %s806_s23, %s956_s23   ;;  %s752_s22 = sphi %s804_s22, %s955_s22   ;;  %s748_s21 = sphi %s802_s21, %s954_s21  }
   0x4   : > { %s827_s27 = sadd.s32 1, %s760_s24   ;;  %s157_s28 = sadd.s32 1, %s756_s23 }
   0x5   : > { %s154_s29 = ssub.s32 %s760_s24, %s827_s27  ;;  %p167_p0 = scmp.ne.s32.totalorder %s756_s23, %s752_s22 }
   0x6   : > { %p155_p1 = scmp.eq.s32.totalorder %s154_s29, 0  ;;  %p168_p2 = scmp.eq.s32.totalorder %s823_s25, 1 }
   0x7   : > { %p173_p3 = scmp.ne.s32.totalorder %s752_s22, %s748_s21  ;;  %p174_p4 = scmp.eq.s32.totalorder %s599_s26, 1 }
   0x8   : > { %s838_s30 = scalar_select %p155_p1, %s756_s23, %s157_s28  }
   0x9   : > { %p840_p5 = por %p168_p2, %p167_p0  ;;  %p844_p6 = por %p174_p4, %p173_p3 }
   0xa   : > { %p602_p7 = scmp.ge.s32.totalorder %s760_s24, 1  ;;  %p214_p8 = scmp.lt.s32.totalorder %s760_s24, 3 }
   0xc   : > { %p215_p9 = pnand %p602_p7, %p214_p8 }
   0xd   : > { %p243_p10 = scmp.lt.s32.totalorder (!%p215_p9), %s823_s25, 1  ;;  %s762_s14 = smov (!%p215_p9), 126  }
   0xe   : > { %218 = sbr.rel (%p215_p9) target bundleno = 1121 (0x461), region = 44  ;;  %s763_s15 = smov (!%p215_p9), 127  }
   0xf   : > { %s240_s29 = sand.u32 (!%p215_p9), 1, %s752_s22   ;;  %s636_s11 = sshll.u32 (!%p215_p9), %s823_s25, 4 }
  0x10   : > { %s718_s26 = scalar_lea.hbm (!%p215_p9), %s951_s6, 32 }
  0x13   : > { %s244_s9 = scalar_select %p243_p10, %s823_s25, 1  ;;  %vm269_vm0 = vcmask 1041408   ;;  %v633_v5 = vld [vmem:[%s946_s1] sm:$0xff]  ;;  %vm265_vm1 = vcmask 31744   ;;  %v349_v6 = vld [vmem:[%s947_s2 + $0x8] sm:$0xff]  ;;  %v764_v7 = vmov 0  }
  0x14   : > { %683 = vset.pattern.permute.xlu1 %v764_v7  ;;  %684 = vset.pattern.permute.xlu0 %v764_v7  ;;  %v348_v8 = vld [vmem:[%s947_s2] sm:$0xff]  ;;  %v635_v11 = vld [vmem:[%s946_s1 + $0x10] sm:$0xff]  ;;  %v634_v14 = vld [vmem:[%s946_s1 + $0x8] sm:$0xff]  ;;  %vm364_vm2 = vcmask 130048   ;;  %s522_s25 = scalar_lea.sflag [#allocation3], %s240_s29 }
  0x15   : > { %s604_s10 = sshll.u32 %s244_s9, 1  ;;  %357 = vperm.xlu1 %683, %v349_v6   ;;  %685 = vset.pattern.permute.xlu2 %v764_v7  ;;  %v362_v32 = vld [vmem:[%s950_s5] sm:$0xff]  ;;  %v363_v34 = vld [vmem:[%s950_s5 + $0x8] sm:$0xff]  ;;  %s603_s9 = sshll.u32 %s240_s29, 4 }
  0x16   : > { %s246_s13 = scalar_lea.vmem %s945_s0, %s604_s10  ;;  %v479_v37 = vld [vmem:[%s949_s4] sm:$0xff]  ;;  %v480_v6 = vld [vmem:[%s949_s4 + $0x8] sm:$0xff]  ;;  %s242_s10 = scalar_lea.vmem [#allocation2], %s603_s9 }
  0x17   : > { %v250_v0 = vld [vmem:[%s246_s13] sm:$0x3] }
  0x18   : > { %260 = vst [vmem:[#allocation1] ss:$4 sm:$0xff] %v250_v0  ;;  %v314_v1 = vld [vmem:[%s246_s13] sm:$0x3]  ;;  %v295_v4 = vsel %vm269_vm0, %v250_v0, 0 }
  0x19   : > { %304 = vmatpush.bf16.msra.mxu1 %v295_v4  ;;  %v463_v63 = vld [vmem:[%s948_s3] sm:$0xff] }
  0x1c   : > { %616 = vmatmul.msk.bf16.vlgmr.msra.gmra.mxu1 %vm265_vm1, %v633_v5 }
  0x1d   : > { %352 = vperm.xlu1 %683, %v348_v8  }
  0x1f   : > { %v261_v2 = vld.sshfl [vmem:[#allocation1] sm:$0xff pattern:$0x73625140] }
  0x20   : > { %321 = vst [vmem:[#allocation1] ss:$4 sm:$0xff] %v314_v1  ;;  %v464_v1 = vld [vmem:[%s948_s3 + $0x8] sm:$0xff] }
  0x27   : > { %v322_v3 = vld.sshfl [vmem:[#allocation1] sm:$0xff pattern:$0x73625140] }
  0x28   : > { %324 = vrot.lane.b32.xlu0 %v322_v3, %s762_s14  ;;  %s533_s14 = scalar_lea.hbm %s951_s6, %s636_s11 }
  0x29   : > { %s536_s16 = sshll.u32 %s533_s14, 4  ;;  %s537_s16 = int_to_ptr.hbm [resolvable:$true] %s536_s16 }
  0x2a   : > { %s712_s17 = sshra.s32 %s537_s16, 4  ;;  %s713_s17 = int_to_ptr.hbm [resolvable:$true] %s712_s17 }
  0x2b   : > { %s714_s18 = scalar_lea.hbm %s713_s17, 16  ;;  %p719_p0 = scmp.lt.s32.totalorder %s713_s17, %s951_s6 }
  0x2c   : > { %p715_p11 = scmp.ne.s32.totalorder %s713_s17, %s714_s18  ;;  %p720_p1 = scmp.lt.s32.totalorder %s718_s26, %s714_s18 }
  0x2e   : > { %p716_p12 = pnand %p715_p11, %p840_p5  ;;  %p721_p2 = por %p720_p1, %p719_p0 }
  0x30   : > { %263 = vrot.lane.b32.xlu0 %v261_v2, %s763_s15  ;;  %s534_s15 = sshll.u32 %s242_s10, 4  ;;  %p717_p13 = pneg %p716_p12  ;;  %s535_s15 = int_to_ptr.vmem [resolvable:$true] %s534_s15 }
  0x32   : > { %p722_p3 = pnand %p721_p2, %p717_p13 }
  0x87   : > { %v358_v18 = vpop.permute.xlu1 %357 }
  0x8f   : > { %v353_v28 = vpop.permute.xlu1 %352 }
  0x99   : > { %v306_v15 = vpop.f32.mrf.mxu1 }
  0x9a   : > { %v325_v9 = vpop.permute.xlu0 %324 }
  0x9b   : > { %v330_v10 = vsel %vm269_vm0, %v325_v9, 0 }
  0x9c   : > { %339 = vmatpush.bf16.msra.mxu2 %v330_v10 }
  0x9f   : > { %623 = vmatmul.msk.bf16.vlgmr.msra.gmra.mxu2 %vm265_vm1, %v635_v11 }
  0xa1   : > { %v308_v19 = vpop.f32.mrf.mxu1 }
  0xa2   : > { %v264_v12 = vpop.permute.xlu0 %263 }
  0xa3   : > { %v271_v13 = vsel %vm269_vm0, %v264_v12, 0 }
  0xa4   : > { %280 = vmatpush.bf16.msra.mxu0 %v271_v13 }
  0xa7   : > { %611 = vmatmul.msk.bf16.vlgmr.msra.gmra.mxu0 %vm265_vm1, %v634_v14 }
 0x122   : > { %v341_v16 = vpop.f32.mrf.mxu2 }
 0x124   : > { %v282_v17 = vpop.f32.mrf.mxu0 }
 0x125   : > { %v307_v23 = vadd.f32 %v306_v15, %v282_v17 }
 0x127   : > { %v346_v26 = vadd.f32 %v341_v16, %v307_v23 }
 0x129   : > { %v360_v29 = vadd.f32 %v353_v28, %v346_v26 }
 0x12a   : > { %v343_v22 = vpop.f32.mrf.mxu2 }
 0x12b   : > { %v365_v30 = vsel %vm364_vm2, %v360_v29, 0.0 }
 0x12c   : > { %v284_v20 = vpop.f32.mrf.mxu0 }
 0x12d   : > { %v309_v21 = vadd.f32 %v308_v19, %v284_v20 }
 0x12f   : > { %v347_v24 = vadd.f32 %v343_v22, %v309_v21 }
 0x131   : > { %v361_v25 = vadd.f32 %v358_v18, %v347_v24 }
 0x133   : > { %v368_v27 = vsel %vm364_vm2, %v361_v25, 0.0 }
 0x134   : > { %369 = vadd.xlane.f32.xlu2 %v368_v27 }
 0x13c   : > { %366 = vadd.xlane.f32.xlu2 %v365_v30 }
 0x1a7   : > { %v370_v31 = vpop.xlane.xlu2 %369 }
 0x1a8   : > { %391 = vmatpush.msra.mxu3 %v370_v31 }
 0x1af   : > { %v367_v33 = vpop.xlane.xlu2 %366 }
 0x1b0   : > { %392 = vmatpush.msra.mxu3 %v367_v33 }
 0x1b1   : > { %624 = vmatmul.msk.f32.vlgmr.msra.gmra.mxu3 %vm364_vm2, %v362_v32 }
 0x1b9   : > { %625 = vmatmul.msk.f32.gmra.mxu3 %vm364_vm2, %v363_v34 }
 0x234   : > { %v394_v35 = vpop.f32.mrf.mxu3 }
 0x235   : > { %402 = vperm.xlu1 %683, %v394_v35  }
 0x23c   : > { %v397_v36 = vpop.f32.mrf.mxu3 }
 0x23d   : > { %407 = vperm.xlu0 %684, %v397_v36  }
 0x245   : > { %483 = vperm.xlu0 %684, %v479_v37  }
 0x2a7   : > { %v403_v38 = vpop.permute.xlu1 %402 }
 0x2a8   : > { %v410_v39 = vsub.f32 %v360_v29, %v403_v38 }
 0x2aa   : > { %v412_v40 = vmul.f32 %v410_v39, %v410_v39 }
 0x2ac   : > { %v414_v41 = vsel %vm364_vm2, %v412_v40, 0.0 }
 0x2ad   : > { %415 = vadd.xlane.f32.xlu1 %v414_v41 }
 0x2af   : > { %v408_v42 = vpop.permute.xlu0 %407 }
 0x2b0   : > { %v890_v43 = vsub.f32 %v361_v25, %v408_v42 }
 0x2b2   : > { %v413_v44 = vmul.f32 %v890_v43, %v890_v43 }
 0x2b4   : > { %v417_v45 = vsel %vm364_vm2, %v413_v44, 0.0 }
 0x2b5   : > { %418 = vadd.xlane.f32.xlu2 %v417_v45 }
 0x2b7   : > { %v484_v9 = vpop.permute.xlu0 %483 }
 0x320   : > { %v416_v47 = vpop.xlane.xlu1 %415 }
 0x328   : > { %v419_v46 = vpop.xlane.xlu2 %418 }
 0x329   : > { %434 = vmatpush.msrb.mxu0 %v419_v46  ;;  %637 = vmatpush.msrb.mxu1 %v419_v46 }
 0x32b   : > { %435 = vmatpush.msrb.mxu0 %v416_v47  ;;  %638 = vmatpush.msrb.mxu1 %v416_v47 }
 0x32c   : > { %626 = vmatmul.msk.f32.vlgmr.msrb.gmra.mxu0 %vm364_vm2, %v362_v32  ;;  %627 = vmatmul.msk.f32.vlgmr.msrb.gmra.mxu1 %vm364_vm2, %v363_v34 }
 0x3a9   : > { %v437_v48 = vpop.f32.mrf.mxu0  ;;  %v440_v49 = vpop.f32.mrf.mxu1 }
 0x3aa   : > { %v438_v50 = vadd.f32 1e-05, %v437_v48  ;;  %v441_v51 = vadd.f32 1e-05, %v440_v49 }
 0x3ac   : > { %686 = vrsqrt.f32 %v438_v50  ;;  %vm449_vm3 = vweird.f32 %v438_v50  ;;  %vm459_vm7 = vweird.f32 %v441_v51 }
 0x3ad   : > { %688 = vrsqrt.f32 %v441_v51 }
 0x3b2   : > { %v687_v52 = vpop.eup %686 }
 0x3b3   : > { %v689_v53 = vpop.eup %688  ;;  %v444_v54 = vmul.f32 %v687_v52, %v438_v50  ;;  %vm450_vm4 = vweird.f32 %v687_v52 }
 0x3b4   : > { %v454_v55 = vmul.f32 %v689_v53, %v441_v51  ;;  %vm451_vm5 = vmor %vm449_vm3, %vm450_vm4  ;;  %vm460_vm6 = vweird.f32 %v689_v53 }
 0x3b5   : > { %v445_v56 = vmul.f32 %v687_v52, %v444_v54  ;;  %vm461_vm8 = vmor %vm459_vm7, %vm460_vm6 }
 0x3b6   : > { %v455_v57 = vmul.f32 %v689_v53, %v454_v55 }
 0x3b7   : > { %v446_v58 = vmul.f32 0.5, %v445_v56 }
 0x3b8   : > { %v456_v59 = vmul.f32 0.5, %v455_v57 }
 0x3b9   : > { %v447_v60 = vsub.f32 1.5, %v446_v58 }
 0x3ba   : > { %v457_v61 = vsub.f32 1.5, %v456_v59 }
 0x3bb   : > { %v448_v62 = vmul.f32 %v687_v52, %v447_v60 }
 0x3bc   : > { %v458_v0 = vmul.f32 %v689_v53, %v457_v61 }
 0x3bd   : > { %v452_v2 = vsel %vm451_vm5, %v687_v52, %v448_v62 }
 0x3be   : > { %v462_v3 = vsel %vm461_vm8, %v689_v53, %v458_v0  ;;  %v465_v4 = vmul.f32 %v463_v63, %v452_v2 }
 0x3bf   : > { %v466_v5 = vmul.f32 %v464_v1, %v462_v3 }
 0x3c0   : > { %469 = vperm.xlu2 %685, %v465_v4  }
 0x3c1   : > { %474 = vperm.xlu0 %684, %v466_v5  }
 0x3c9   : > { %488 = vperm.xlu0 %684, %v480_v6  }
 0x41a   : > { %v470_v7 = vpop.permute.xlu2 %469 }
 0x41b   : > { %v477_v8 = vmul.f32 %v470_v7, %v410_v39 }
 0x41d   : > { %v491_v10 = vadd.f32 %v484_v9, %v477_v8 }
 0x41f   : > { %v493_v11 = vmul.f32 1.442695, %v491_v10  ;;  %vm515_vm9 = vcmp.gt.f32.partialorder %v491_v10, 20.0 }
 0x421   : > { %690 = vpow2.f32 %v493_v11 }
 0x427   : > { %v691_v12 = vpop.eup %690 }
 0x428   : > { %v497_v13 = vadd.f32 2.0, %v691_v12 }
 0x42a   : > { %v499_v14 = vmul.f32 %v691_v12, %v497_v13 }
 0x42c   : > { %v501_v15 = vadd.f32 2.0, %v499_v14  ;;  %v511_v21 = vmul.f32 %v499_v14, %v491_v10 }
 0x42e   : > { %692 = vrcp.f32 %v501_v15 }
 0x433   : > { %v475_v16 = vpop.permute.xlu0 %474 }
 0x434   : > { %v693_v17 = vpop.eup %692  ;;  %v478_v22 = vmul.f32 %v475_v16, %v890_v43 }
 0x435   : > { %v505_v18 = vmul.f32 %v693_v17, %v501_v15 }
 0x437   : > { %v507_v19 = vsub.f32 2.0, %v505_v18 }
 0x439   : > { %v509_v20 = vmul.f32 %v693_v17, %v507_v19 }
 0x43b   : > { %v513_v23 = vmul.f32 %v511_v21, %v509_v20  ;;  %v489_v24 = vpop.permute.xlu0 %488 }
 0x43c   : > { %v492_v25 = vadd.f32 %v489_v24, %v478_v22 }
 0x43d   : > { %v517_v26 = vsel %vm515_vm9, %v491_v10, %v513_v23 }
 0x43e   : > { %v495_v27 = vmul.f32 1.442695, %v492_v25  ;;  %519 = vst.msk [vmem:[%s242_s10] sm:$0xff] %vm364_vm2, %v517_v26  ;;  %vm516_vm10 = vcmp.gt.f32.partialorder %v492_v25, 20.0 }
 0x440   : > { %694 = vpow2.f32 %v495_v27 }
 0x446   : > { %v695_v28 = vpop.eup %694 }
 0x447   : > { %v498_v29 = vadd.f32 2.0, %v695_v28 }
 0x449   : > { %v500_v30 = vmul.f32 %v695_v28, %v498_v29 }
 0x44b   : > { %v502_v31 = vadd.f32 2.0, %v500_v30  ;;  %v512_v36 = vmul.f32 %v500_v30, %v492_v25 }
 0x44d   : > { %696 = vrcp.f32 %v502_v31 }
 0x453   : > { %v697_v32 = vpop.eup %696 }
 0x454   : > { %v506_v33 = vmul.f32 %v697_v32, %v502_v31 }
 0x456   : > { %v508_v34 = vsub.f32 2.0, %v506_v33 }
 0x458   : > { %v510_v35 = vmul.f32 %v697_v32, %v508_v34 }
 0x45a   : > { %v514_v37 = vmul.f32 %v512_v36, %v510_v35 }
 0x45c   : > { %v518_v38 = vsel %vm516_vm10, %v492_v25, %v514_v37 }
 0x45d   : > { %520 = vst.msk [vmem:[%s242_s10 + $0x8] sm:$0xff] %vm364_vm2, %v518_v38 }
 0x45e   : > { %725 = shalt.err (!%p722_p3)
}
 0x45f   : > { %s765_s29 = smov 128   ;;  %s766_s10 = smov 8  }
 0x460   : > { %639 = dma.vmem_to_hbm [thread:$0]  (%p840_p5), %s535_s15, 256, %s537_s16, %s522_s25, %s765_s29, %s765_s29, %s766_s10  }
 0x461 PF: > { %p645_p4 = scmp.ge.s32.totalorder %s760_s24, 2  ;;  %s551_s11 = sand.u32 1, %s748_s21  }
 0x462   : > { %s552_s12 = scalar_lea.sflag [#allocation3], %s551_s11 }
 0x463   : > { %p642_p7 = pnand %p645_p4, %p844_p6 }
 0x465   : > { %p643_p8 = pneg %p642_p7 }
 0x467   : > { %743 = dma.done.wait (%p643_p8), %s552_s12, 256  }
 0x468   : > { %745 = vsyncadd (%p643_p8), %s552_s12, 4294967040  ;;  %p16_p9 = scmp.ge.s32.totalorder %s827_s27, 4   ;;  %s954_s21 = smov %s752_s22 }
 0x469   : > { %s955_s22 = smov %s756_s23  ;;  %s956_s23 = smov %s838_s30 }
 0x46a   : > { %s957_s24 = smov %s827_s27  ;;  %18 = sbr.rel (!%p16_p9) target bundleno = 3 (0x3), region = 81 }
 0x46f   :  { %558 = vsyncpa [#allocation3], 1 }
 0x470   :  { %560 = vsyncpa [#allocation3 + $0x1], 1 }

</bundles_post_ra>
